<compile_context>
chip_gen: v7x
topology: tpu7x:2x2x1
jax: 0.10.0
libtpu: 0.0.40
codegen_flags: <defaults>
</compile_context>

<pallas_src>
import jax
import jax.numpy as jnp
from jax.experimental import pallas as pl
from jax.experimental.pallas import tpu as pltpu


def _round_up(n, m):
    return (n + m - 1) // m * m


def _make_kernel(n_inputs):
    """Kernel over one batch tile.

    Ref order:
      x_0..x_{n-1},
      wa_{0,0}..wa_{n-1,n-1}   (W_att[rows_j, cols_k], bf16, j-major),
      wf_0..wf_{n-1}           (W_fc[rows_j, :O_pad], bf16),
      ba_0..ba_{n-1}           (b_att[:, cols_k], f32),
      b_fc                     ((1, O_pad), f32),
      out                      ((tile, O_pad), f32)

    The concat is expressed as sums of partial matmuls over row/column
    partitions of the weights -- no concatenated activation and no
    lane-crossing slice of the gate is ever built.
    """
    n = n_inputs

    def kernel(*refs):
        p = 0
        xs = refs[p:p + n]; p += n
        was = refs[p:p + n * n]; p += n * n
        wfs = refs[p:p + n]; p += n
        bas = refs[p:p + n]; p += n
        bf_ref = refs[p]
        out_ref = refs[p + 1]

        # Load activation tiles once; bf16 copies for the MXU, f32 for gating.
        xraw = [r[...] for r in xs]
        xb = [v.astype(jnp.bfloat16) for v in xraw]
        x32 = [v.astype(jnp.float32) for v in xraw]

        out = bf_ref[...]                            # (1, O_pad) f32, broadcasts
        for k in range(n):
            # gate_k = sigmoid(sum_j x_j @ W_att[rows_j, cols_k] + b_att[cols_k])
            acc = bas[k][...]                        # (1, d_k) f32, broadcasts
            for j in range(n):
                acc = acc + jnp.dot(xb[j], was[j * n + k][...],
                                    preferred_element_type=jnp.float32)
            # sigmoid on the EUP path: exp + approximate reciprocal.
            gate = pl.reciprocal(1.0 + jnp.exp(-acc), approx=True)

            # (gate_k * x_k) @ W_fc[rows_k]  -- lane-aligned, no slicing.
            h = (gate * x32[k]).astype(jnp.bfloat16)
            out = out + jnp.dot(h, wfs[k][...],
                                preferred_element_type=jnp.float32)

        out_ref[...] = out.astype(out_ref.dtype)

    return kernel


def prepare_params(params, d_sizes):
    """One-time weight preparation (do NOT call per forward pass).

    Row/column-partitions W_att per input, row-partitions W_fc, zero-pads the
    fc output dim to a multiple of 128 (lane-dense stores), casts matmul
    weights to bf16 and biases to f32.
    """
    w_att, b_att, w_fc, b_fc = params
    D = w_att.shape[0]
    O = w_fc.shape[1]
    assert w_att.shape == (D, D) and b_att.shape == (1, D)
    assert w_fc.shape == (D, O) and b_fc.shape == (1, O)
    d_sizes = tuple(int(d) for d in d_sizes)
    assert sum(d_sizes) == D, "feature widths must sum to input_dim"
    n = len(d_sizes)
    O_pad = _round_up(O, 128)

    offs = [0]
    for d in d_sizes:
        offs.append(offs[-1] + d)

    wa = tuple(
        w_att[offs[j]:offs[j + 1], offs[k]:offs[k + 1]].astype(jnp.bfloat16)
        for j in range(n) for k in range(n)
    )
    ba = tuple(
        b_att[:, offs[k]:offs[k + 1]].astype(jnp.float32) for k in range(n)
    )
    wf_pad = w_fc if O_pad == O else jnp.pad(w_fc, ((0, 0), (0, O_pad - O)))
    wf = tuple(
        wf_pad[offs[j]:offs[j + 1], :].astype(jnp.bfloat16) for j in range(n)
    )
    bf = (b_fc if O_pad == O else jnp.pad(b_fc, ((0, 0), (0, O_pad - O))))
    bf = bf.astype(jnp.float32)

    return dict(wa=wa, ba=ba, wf=wf, bf=bf,
                d_sizes=d_sizes, n=n, D=D, O=O, O_pad=O_pad)


def _choose_batch_tile(B, batch_tile):
    assert batch_tile % 8 == 0
    if B > batch_tile:
        return batch_tile
    if B >= 256:
        # Batch fits one block but is large: split in two so a v7x megacore
        # ("parallel" batch axis) can use both TensorCores.
        return _round_up(-(-B // 2), 8)
    return _round_up(B, 8)


def concat_fusion_forward(x, y, prep, use_audio=False, *, batch_tile=512):
    """Pallas-backed forward pass of ConcatFusion using prepared params."""
    xs = (x, y) if use_audio else (x,)
    n = prep["n"]
    d_sizes = prep["d_sizes"]
    assert len(xs) == n, "prepared params were built for a different use_audio"
    for a, d in zip(xs, d_sizes):
        assert a.shape[1] == d, "activation width mismatch with prepared params"

    B = xs[0].shape[0]
    O, O_pad = prep["O"], prep["O_pad"]

    tile = _choose_batch_tile(B, batch_tile)
    grid = (pl.cdiv(B, tile),)   # ragged last block handled by Pallas masking

    resident = dict(pipeline_mode=pl.Buffered(1))  # fetched once, never change
    in_specs = (
        [pl.BlockSpec((tile, d), lambda i: (i, 0)) for d in d_sizes]           # x_k
        + [pl.BlockSpec((d_sizes[j], d_sizes[k]), lambda i: (0, 0), **resident)
           for j in range(n) for k in range(n)]                                 # W_att blocks
        + [pl.BlockSpec((d, O_pad), lambda i: (0, 0), **resident)
           for d in d_sizes]                                                    # W_fc rows
        + [pl.BlockSpec((1, d), lambda i: (0, 0), **resident) for d in d_sizes]  # b_att cols
        + [pl.BlockSpec((1, O_pad), lambda i: (0, 0), **resident)]               # b_fc
    )

    out = pl.pallas_call(
        _make_kernel(n),
        out_shape=jax.ShapeDtypeStruct((B, O_pad), jnp.float32),
        grid_spec=pltpu.PrefetchScalarGridSpec(
            num_scalar_prefetch=0,
            grid=grid,
            in_specs=in_specs,
            out_specs=pl.BlockSpec((tile, O_pad), lambda i: (i, 0)),
        ),
        compiler_params=pltpu.CompilerParams(
            dimension_semantics=("parallel",),
            # Actual use at D=1024, tile=512 is ~7-10 MiB; 48 MiB leaves
            # headroom for larger D while staying inside v7x's 64 MiB VMEM.
            vmem_limit_bytes=48 * 1024 * 1024,
        ),
    )(*xs, *prep["wa"], *prep["wf"], *prep["ba"], prep["bf"])

    # Exact result: drop the zero-padded fc lanes (numerically a no-op).
    return out if O_pad == O else out[:, :O]


def init_params(key, input_dim, output_dim):
    """Deterministic synthetic parameters (same shapes as the PyTorch module)."""
    k1, k2, k3, k4 = jax.random.split(key, 4)
    # stored as (in, out) == PyTorch weight.T
    w_att = jax.random.normal(k1, (input_dim, input_dim), jnp.float32) * 0.02
    b_att = jax.random.normal(k2, (1, input_dim), jnp.float32) * 0.02
    w_fc = jax.random.normal(k3, (input_dim, output_dim), jnp.float32) * 0.02
    b_fc = jax.random.normal(k4, (1, output_dim), jnp.float32) * 0.02
    return (w_att, b_att, w_fc, b_fc)


def reference_forward(x, y, params, use_audio=False):
    """Pure-JAX f32 reference mirroring the PyTorch module exactly."""
    w_att, b_att, w_fc, b_fc = params
    out = jnp.concatenate((x, y), axis=1) if use_audio else x
    out = jax.nn.sigmoid(out @ w_att + b_att) * out
    return out @ w_fc + b_fc


if __name__ == "__main__":
    # Small shapes consistent with the module: (batch, input_dim) vectors.
    input_dim = 128     # stands in for 1024
    output_dim = 64     # stands in for 100 (padded to 128 inside the wrapper)

    key = jax.random.PRNGKey(0)
    kx, ky, kp = jax.random.split(key, 3)
    params = init_params(kp, input_dim, output_dim)

    # --- default path (use_audio=False): x already has full input_dim ---
    batch = 8
    x = jax.random.normal(kx, (batch, input_dim), jnp.float32)
    y = jax.random.normal(ky, (batch, input_dim), jnp.float32)  # unused here
    prep_full = prepare_params(params, (input_dim,))             # one-time prep
    out = jax.block_until_ready(
        concat_fusion_forward(x, y, prep_full, use_audio=False))
    ref = reference_forward(x, y, params, use_audio=False)
    assert out.shape == (batch, output_dim)
    # bf16 MXU inputs (f32 accumulation) + approx reciprocal => loose tolerance.
    assert jnp.allclose(out, ref, atol=1e-2, rtol=1e-2)
    # TODO(synk): add an f32-MXU (precision=HIGHEST) path for users needing bit parity.

    # --- concat path (use_audio=True), ragged batch (exercises cdiv masking) ---
    batch2 = 12
    xh = jax.random.normal(kx, (batch2, input_dim // 2), jnp.float32)
    yh = jax.random.normal(ky, (batch2, input_dim // 2), jnp.float32)
    prep_split = prepare_params(params, (input_dim // 2, input_dim // 2))
    out2 = jax.block_until_ready(
        concat_fusion_forward(xh, yh, prep_split, use_audio=True))
    ref2 = reference_forward(xh, yh, params, use_audio=True)
    assert out2.shape == (batch2, output_dim)
    assert jnp.allclose(out2, ref2, atol=1e-2, rtol=1e-2)

    print("KERNEL_OK")
</pallas_src>

<mosaic_0001>
module attributes {stable_mosaic.version = 11 : i64} {
  func.func @kernel(%arg0: i32, %arg1: memref<8x128xf32, #tpu.memory_space<vmem>>, %arg2: memref<128x128xbf16, #tpu.memory_space<vmem>>, %arg3: memref<128x128xbf16, #tpu.memory_space<vmem>>, %arg4: memref<1x128xf32, #tpu.memory_space<vmem>>, %arg5: memref<1x128xf32, #tpu.memory_space<vmem>>, %arg6: memref<8x128xf32, #tpu.memory_space<vmem>>) attributes {dimension_semantics = [#tpu.dimension_semantics<parallel>], iteration_bounds = array<i64: 1>, scalar_prefetch = 0 : i64, scratch_operands = 0 : i64, tpu.core_type = #tpu.core_type<tc>, window_params = [{transform_indices = @transform_0, window_bounds = array<i64: 8, 128>}, {pipeline_mode = #tpu.pipeline_mode<synchronous>, transform_indices = @transform_1, window_bounds = array<i64: 128, 128>}, {pipeline_mode = #tpu.pipeline_mode<synchronous>, transform_indices = @transform_2, window_bounds = array<i64: 128, 128>}, {pipeline_mode = #tpu.pipeline_mode<synchronous>, transform_indices = @transform_3, window_bounds = array<i64: 1, 128>}, {pipeline_mode = #tpu.pipeline_mode<synchronous>, transform_indices = @transform_4, window_bounds = array<i64: 1, 128>}, {transform_indices = @transform_5, window_bounds = array<i64: 8, 128>}]} {
    %c0 = arith.constant 0 : index
    %c0_0 = arith.constant 0 : index
    %0 = vector.load %arg1[%c0, %c0_0] : memref<8x128xf32, #tpu.memory_space<vmem>>, vector<8x128xf32>
    %1 = arith.truncf %0 : vector<8x128xf32> to vector<8x128xbf16>
    %c0_1 = arith.constant 0 : index
    %c0_2 = arith.constant 0 : index
    %2 = vector.load %arg5[%c0_1, %c0_2] : memref<1x128xf32, #tpu.memory_space<vmem>>, vector<1x128xf32>
    %c0_3 = arith.constant 0 : index
    %c0_4 = arith.constant 0 : index
    %3 = vector.load %arg4[%c0_3, %c0_4] : memref<1x128xf32, #tpu.memory_space<vmem>>, vector<1x128xf32>
    %c0_5 = arith.constant 0 : index
    %c0_6 = arith.constant 0 : index
    %4 = vector.load %arg2[%c0_5, %c0_6] : memref<128x128xbf16, #tpu.memory_space<vmem>>, vector<128x128xbf16>
    %cst = arith.constant dense<0.000000e+00> : vector<8x128xf32>
    %5 = tpu.matmul %1, %4, %cst {dimension_numbers = #tpu.dot_dimension_numbers<[1], [0], [0], [1], [0, 0, 1, 1], [], []>} : vector<8x128xbf16>, vector<128x128xbf16>, vector<8x128xf32> -> vector<8x128xf32>
    %6 = vector.broadcast %3 : vector<1x128xf32> to vector<8x128xf32>
    %7 = arith.addf %6, %5 : vector<8x128xf32>
    %cst_7 = arith.constant 0.000000e+00 : f32
    %8 = vector.broadcast %cst_7 : f32 to vector<8x128xf32>
    %9 = arith.subf %8, %7 : vector<8x128xf32>
    %10 = math.exp %9 : vector<8x128xf32>
    %cst_8 = arith.constant 1.000000e+00 : f32
    %11 = vector.broadcast %cst_8 : f32 to vector<8x128xf32>
    %12 = arith.addf %11, %10 : vector<8x128xf32>
    %13 = tpu.reciprocal %12 {approx = true} : vector<8x128xf32> -> vector<8x128xf32>
    %14 = arith.mulf %13, %0 : vector<8x128xf32>
    %15 = arith.truncf %14 : vector<8x128xf32> to vector<8x128xbf16>
    %c0_9 = arith.constant 0 : index
    %c0_10 = arith.constant 0 : index
    %16 = vector.load %arg3[%c0_9, %c0_10] : memref<128x128xbf16, #tpu.memory_space<vmem>>, vector<128x128xbf16>
    %cst_11 = arith.constant dense<0.000000e+00> : vector<8x128xf32>
    %17 = tpu.matmul %15, %16, %cst_11 {dimension_numbers = #tpu.dot_dimension_numbers<[1], [0], [0], [1], [0, 0, 1, 1], [], []>} : vector<8x128xbf16>, vector<128x128xbf16>, vector<8x128xf32> -> vector<8x128xf32>
    %18 = vector.broadcast %2 : vector<1x128xf32> to vector<8x128xf32>
    %19 = arith.addf %18, %17 : vector<8x128xf32>
    %c0_12 = arith.constant 0 : index
    %c0_13 = arith.constant 0 : index
    %20 = vector.load %arg6[%c0_12, %c0_13] : memref<8x128xf32, #tpu.memory_space<vmem>>, vector<8x128xf32>
    tpu.vector_store %arg6[%c0_12, %c0_13], %19 {strides = array<i32>} : memref<8x128xf32, #tpu.memory_space<vmem>>, vector<8x128xf32>,
    return
  }
  func.func @transform_0(%arg0: i32) -> (i32, i32) {
    %c0_i32 = arith.constant 0 : i32
    %c0_i32_0 = arith.constant 0 : i32
    return %arg0, %c0_i32 : i32, i32
  }
  func.func @transform_1(%arg0: i32) -> (i32, i32) {
    %c0_i32 = arith.constant 0 : i32
    %c0_i32_0 = arith.constant 0 : i32
    %c0_i32_1 = arith.constant 0 : i32
    return %c0_i32, %c0_i32_0 : i32, i32
  }
  func.func @transform_2(%arg0: i32) -> (i32, i32) {
    %c0_i32 = arith.constant 0 : i32
    %c0_i32_0 = arith.constant 0 : i32
    %c0_i32_1 = arith.constant 0 : i32
    return %c0_i32, %c0_i32_0 : i32, i32
  }
  func.func @transform_3(%arg0: i32) -> (i32, i32) {
    %c0_i32 = arith.constant 0 : i32
    %c0_i32_0 = arith.constant 0 : i32
    %c0_i32_1 = arith.constant 0 : i32
    return %c0_i32, %c0_i32_0 : i32, i32
  }
  func.func @transform_4(%arg0: i32) -> (i32, i32) {
    %c0_i32 = arith.constant 0 : i32
    %c0_i32_0 = arith.constant 0 : i32
    %c0_i32_1 = arith.constant 0 : i32
    return %c0_i32, %c0_i32_0 : i32, i32
  }
  func.func @transform_5(%arg0: i32) -> (i32, i32) {
    %c0_i32 = arith.constant 0 : i32
    %c0_i32_0 = arith.constant 0 : i32
    return %arg0, %c0_i32 : i32, i32
  }
}

</mosaic_0001>

<bundles_post_ra>
// kernel: tpu_custom_call.1
= control target key start
LH: loop header
LB: loop body
LE: loop exit
PB: predicated region body
PF: predicated region fallthrough
CT: control target
= control target key end

     0   :  { %10 = vsyncpa [#allocation3], 0  ;;  %s607_s0 = inlined_call_operand.hbm [shape: f32[8,128], index: 0, kind: input, shape index: {}]   ;;  %s608_s1 = inlined_call_operand.hbm [shape: bf16[128,128], index: 1, kind: input, shape index: {}]   ;;  %s609_s2 = inlined_call_operand.hbm [shape: bf16[128,128], index: 2, kind: input, shape index: {}]   ;;  %s610_s3 = inlined_call_operand.vmem [shape: f32[1,128], index: 3, kind: input, shape index: {}]   ;;  %s611_s4 = inlined_call_operand.vmem [shape: f32[1,128], index: 4, kind: input, shape index: {}]   ;;  %s612_s5 = inlined_call_operand.hbm [shape: f32[8,128], index: 5, kind: output, shape index: {}]  }
   0x1   :  { %11 = vsyncpa [#allocation6], 0 }
   0x2   :  { %12 = vsyncpa [#allocation4], 0  ;;  %s509_s18 = smov [#allocation5]   ;;  %s415_s22 = scalar_lea.hbm %s608_s1, 1024 }
   0x3   :  { %s28_s19 = sshll.u32 %s509_s18, 4  ;;  %p416_p0 = scmp.ne.s32.totalorder %s608_s1, %s415_s22  ;;  %s29_s19 = int_to_ptr.vmem [resolvable:$true] %s28_s19 }
   0x4   :  { %p419_p1 = scmp.lt.u32.totalorder %s415_s22, %s608_s1 }
   0x6   :  { %p421_p2 = pnand %p419_p1, %p416_p0 }
   0x8   :  { %424 = shalt.err (!%p421_p2)
}
   0x9   :  { %s425_s27 = scalar_lea.vmem %s29_s19, 1024  ;;  %p430_p4 = scmp.lt.s32.totalorder %s29_s19, %s29_s19 }
   0xa   :  { %p426_p3 = scmp.ne.s32.totalorder %s29_s19, %s425_s27  ;;  %p431_p5 = scmp.lt.s32.totalorder %s425_s27, %s425_s27 }
   0xc   :  { %p432_p6 = por %p431_p5, %p430_p4 }
   0xe   :  { %p433_p7 = pnand %p432_p6, %p426_p3 }
  0x10   :  { %436 = shalt.err (!%p433_p7)
}
  0x11   :  { %s510_s28 = smov 64   ;;  %s511_s29 = smov 4  }
  0x12   :  { %34 = dma.hbm_to_vmem [thread:$0]  %s608_s1, 1024, %s29_s19, [#allocation6], %s510_s28, %s510_s28, %s511_s29  }
  0x13   :  { %s512_s7 = smov [#allocation2]   ;;  %s513_s9 = smov [#allocation7]  }
  0x14   :  { %s19_s8 = sshll.u32 %s512_s7, 4  ;;  %s40_s10 = sshll.u32 %s513_s9, 4  ;;  %s20_s8 = int_to_ptr.vmem [resolvable:$true] %s19_s8  ;;  %s41_s10 = int_to_ptr.vmem [resolvable:$true] %s40_s10 }
  0x15   :  { %s437_s13 = scalar_lea.hbm %s607_s0, 128 }
  0x16   :  { %p438_p8 = scmp.ne.s32.totalorder %s607_s0, %s437_s13  ;;  %p441_p9 = scmp.lt.u32.totalorder %s437_s13, %s607_s0 }
  0x18   :  { %p443_p10 = pnand %p441_p9, %p438_p8 }
  0x1a   :  { %446 = shalt.err (!%p443_p10)
}
  0x1b   :  { %s447_s1 = scalar_lea.vmem %s20_s8, 128  ;;  %p452_p12 = scmp.lt.s32.totalorder %s20_s8, %s20_s8 }
  0x1c   :  { %p448_p11 = scmp.ne.s32.totalorder %s20_s8, %s447_s1  ;;  %p453_p13 = scmp.lt.s32.totalorder %s447_s1, %s447_s1 }
  0x1e   :  { %p454_p0 = por %p453_p13, %p452_p12 }
  0x20   :  { %p455_p1 = pnand %p454_p0, %p448_p11 }
  0x22   :  { %458 = shalt.err (!%p455_p1)
}
  0x23   :  { %22 = dma.hbm_to_vmem [thread:$0]  %s607_s0, 128, %s20_s8, [#allocation3]  }
  0x24   :  { %s459_s22 = scalar_lea.hbm %s609_s2, 1024 }
  0x25   :  { %p460_p2 = scmp.ne.s32.totalorder %s609_s2, %s459_s22  ;;  %p463_p3 = scmp.lt.u32.totalorder %s459_s22, %s609_s2 }
  0x27   :  { %p465_p4 = pnand %p463_p3, %p460_p2 }
  0x29   :  { %468 = shalt.err (!%p465_p4)
}
  0x2a   :  { %s469_s27 = scalar_lea.vmem %s41_s10, 1024  ;;  %p474_p6 = scmp.lt.s32.totalorder %s41_s10, %s41_s10 }
  0x2b   :  { %p470_p5 = scmp.ne.s32.totalorder %s41_s10, %s469_s27  ;;  %p475_p7 = scmp.lt.s32.totalorder %s469_s27, %s469_s27 }
  0x2d   :  { %p476_p8 = por %p475_p7, %p474_p6 }
  0x2f   :  { %p477_p9 = pnand %p476_p8, %p470_p5 }
  0x31   :  { %480 = shalt.err (!%p477_p9)
}
  0x32   :  { %46 = dma.hbm_to_vmem [thread:$0]  %s609_s2, 1024, %s41_s10, [#allocation6], %s510_s28, %s510_s28, %s511_s29  }
  0x33   :  { %503 = dma.done.wait [#allocation3], 128  }
  0x34   :  { %504 = vsyncadd [#allocation3], 4294967168 }
  0x35   :  { %505 = dma.done.wait [#allocation6], 2048  }
  0x36   :  { %506 = vsyncadd [#allocation6], 4294965248  ;;  %v514_v0 = vmov 0.0   ;;  %vm515_vm0 = vmmov 0   ;;  %v395_v1 = vld [vmem:[#allocation5] sm:$0xff]   ;;  %v396_v2 = vld [vmem:[#allocation5 + $0x8] sm:$0xff]  }
  0x37   :  { %347 = vmatprep.subr.bf16.mxu0 %v514_v0  ;;  %363 = vmatprep.mubr.msk.bf16.mxu0 %vm515_vm0, %v514_v0  ;;  %v397_v3 = vld [vmem:[#allocation5 + $0x10] sm:$0xff]   ;;  %v398_v4 = vld [vmem:[#allocation5 + $0x18] sm:$0xff]   ;;  %v399_v5 = vld [vmem:[#allocation5 + $0x20] sm:$0xff]  }
  0x38   :  { %367 = vmatprep.subr.bf16.mxu1 %v514_v0  ;;  %383 = vmatprep.mubr.msk.bf16.mxu1 %vm515_vm0, %v514_v0  ;;  %v400_v6 = vld [vmem:[#allocation5 + $0x28] sm:$0xff]   ;;  %v401_v7 = vld [vmem:[#allocation5 + $0x30] sm:$0xff]   ;;  %v402_v8 = vld [vmem:[#allocation5 + $0x38] sm:$0xff]  }
  0x39   :  { %348 = vmatpush3.bf16.msra.mxu0 %v395_v1  ;;  %v61_v9 = vld [vmem:[#allocation2] sm:$0xff]  ;;  %v403_v11 = vld [vmem:[#allocation7] sm:$0xff]   ;;  %v404_v12 = vld [vmem:[#allocation7 + $0x8] sm:$0xff]  }
  0x3a   :  { %349 = vmatprep.subr.bf16.mxu0 %v514_v0  ;;  %v62_v10 = vpack.c.bf16 %v61_v9, %v61_v9  ;;  %368 = vmatpush3.bf16.msra.mxu1 %v403_v11  ;;  %v405_v13 = vld [vmem:[#allocation7 + $0x10] sm:$0xff]   ;;  %v406_v14 = vld [vmem:[#allocation7 + $0x18] sm:$0xff]   ;;  %v407_v15 = vld [vmem:[#allocation7 + $0x20] sm:$0xff]  }
  0x3b   :  { %369 = vmatprep.subr.bf16.mxu1 %v514_v0  ;;  %v408_v16 = vld [vmem:[#allocation7 + $0x28] sm:$0xff]   ;;  %v409_v17 = vld [vmem:[#allocation7 + $0x30] sm:$0xff]   ;;  %v410_v18 = vld [vmem:[#allocation7 + $0x38] sm:$0xff]  }
  0x3c   :  { %v319_v19 = vld [vmem:[%s610_s3] ss:$0 sm:$0xff]  ;;  %s516_s3 = smov [#allocation8]  }
  0x3d   :  { %350 = vmatpush3.bf16.msra.mxu0 %v396_v2  ;;  %v328_v32 = vld [vmem:[%s611_s4] ss:$0 sm:$0xff]  ;;  %s301_s7 = sshll.u32 %s516_s3, 4  ;;  %s302_s7 = int_to_ptr.vmem [resolvable:$true] %s301_s7 }
  0x3e   :  { %351 = vmatprep.subr.bf16.mxu0 %v514_v0  ;;  %370 = vmatpush3.bf16.msra.mxu1 %v404_v12  ;;  %s481_s8 = scalar_lea.vmem %s302_s7, 128  ;;  %p486_p11 = scmp.lt.s32.totalorder %s302_s7, %s302_s7 }
  0x3f   :  { %371 = vmatprep.subr.bf16.mxu1 %v514_v0  ;;  %p482_p10 = scmp.ne.s32.totalorder %s302_s7, %s481_s8  ;;  %p487_p12 = scmp.lt.s32.totalorder %s481_s8, %s481_s8 }
  0x41   :  { %352 = vmatpush3.bf16.msra.mxu0 %v397_v3  ;;  %p488_p13 = por %p487_p12, %p486_p11 }
  0x42   :  { %353 = vmatprep.subr.bf16.mxu0 %v514_v0  ;;  %372 = vmatpush3.bf16.msra.mxu1 %v405_v13 }
  0x43   :  { %373 = vmatprep.subr.bf16.mxu1 %v514_v0  ;;  %p489_p0 = pnand %p488_p13, %p482_p10 }
  0x45   :  { %354 = vmatpush3.bf16.msra.mxu0 %v398_v4 }
  0x46   :  { %355 = vmatprep.subr.bf16.mxu0 %v514_v0  ;;  %374 = vmatpush3.bf16.msra.mxu1 %v406_v14 }
  0x47   :  { %375 = vmatprep.subr.bf16.mxu1 %v514_v0 }
  0x49   :  { %356 = vmatpush3.bf16.msra.mxu0 %v399_v5 }
  0x4a   :  { %357 = vmatprep.subr.bf16.mxu0 %v514_v0  ;;  %376 = vmatpush3.bf16.msra.mxu1 %v407_v15 }
  0x4b   :  { %377 = vmatprep.subr.bf16.mxu1 %v514_v0 }
  0x4d   :  { %358 = vmatpush3.bf16.msra.mxu0 %v400_v6 }
  0x4e   :  { %359 = vmatprep.subr.bf16.mxu0 %v514_v0  ;;  %378 = vmatpush3.bf16.msra.mxu1 %v408_v16 }
  0x4f   :  { %379 = vmatprep.subr.bf16.mxu1 %v514_v0 }
  0x51   :  { %360 = vmatpush3.bf16.msra.mxu0 %v401_v7 }
  0x52   :  { %361 = vmatprep.subr.bf16.mxu0 %v514_v0  ;;  %380 = vmatpush3.bf16.msra.mxu1 %v409_v17 }
  0x53   :  { %381 = vmatprep.subr.bf16.mxu1 %v514_v0 }
  0x55   :  { %362 = vmatpush3.bf16.msra.mxu0 %v402_v8 }
  0x56   :  { %382 = vmatpush3.bf16.msra.mxu1 %v410_v18 }
  0x58   :  { %364 = vmatmul.mubr.bf16.vlgmr.msra.gmra.mrb[0].mxu0 %v62_v10 }
 0x12b   :  { %v163_v20 = vpop.f32.mrb[0].mxu0 }
 0x12c   :  { %v175_v21 = vadd.f32 %v319_v19, %v163_v20  ;;  %v365_v22 = vpop.f32.mrb[1].mxu0 }
 0x12d   :  { %v166_v23 = vpop.f32.mrb[2].mxu0 }
 0x12e   :  { %v176_v24 = vsub.f32 0.0, %v175_v21  ;;  %v366_v25 = vpop.f32.mrb[3].mxu0 }
 0x130   :  { %v177_v26 = vmul.f32 1.442695, %v176_v24 }
 0x132   :  { %411 = vpow2.f32 %v177_v26 }
 0x13c   :  { %v412_v27 = vpop.eup %411 }
 0x13d   :  { %v179_v28 = vadd.f32 1.0, %v412_v27 }
 0x13f   :  { %413 = vrcp.f32 %v179_v28 }
 0x149   :  { %v414_v29 = vpop.eup %413 }
 0x14a   :  { %v181_v30 = vmul.f32 %v414_v29, %v61_v9 }
 0x14c   :  { %v182_v31 = vpack.c.bf16 %v181_v30, %v181_v30 }
 0x14e   :  { %384 = vmatmul.mubr.bf16.vlgmr.msra.gmra.mrb[0].mxu1 %v182_v31 }
 0x221   :  { %v281_v33 = vpop.f32.mrb[0].mxu1 }
 0x222   :  { %v293_v34 = vadd.f32 %v328_v32, %v281_v33  ;;  %v385_v35 = vpop.f32.mrb[1].mxu1 }
 0x223   :  { %v284_v36 = vpop.f32.mrb[2].mxu1 }
 0x224   :  { %294 = vst [vmem:[#allocation8] sm:$0xff] %v293_v34  ;;  %v386_v37 = vpop.f32.mrb[3].mxu1 }
 0x225   :  { %492 = shalt.err (!%p489_p0)
}
 0x226   :  { %s493_s4 = scalar_lea.hbm %s612_s5, 128 }
 0x227   :  { %p494_p1 = scmp.ne.s32.totalorder %s612_s5, %s493_s4  ;;  %p497_p2 = scmp.lt.u32.totalorder %s493_s4, %s612_s5 }
 0x229   :  { %p499_p3 = pnand %p497_p2, %p494_p1 }
 0x22b   :  { %502 = shalt.err (!%p499_p3)
}
 0x22c   :  { %304 = dma.vmem_to_hbm [thread:$0]  %s302_s7, 128, %s612_s5, [#allocation4]  }
 0x22d   :  { %507 = dma.done.wait [#allocation4], 128  }
 0x22e   :  { %508 = vsyncadd [#allocation4], 4294967168 }
 0x22f   :  { %308 = vsyncpa [#allocation3], 1 }
 0x230   :  { %309 = vsyncpa [#allocation6], 1 }
 0x231   :  { %310 = vsyncpa [#allocation4], 1 }

</bundles_post_ra>
